<compile_context>
chip_gen: v7x
topology: tpu7x:2x2x1
jax: 0.10.0
libtpu: 0.0.40
codegen_flags: <defaults>
</compile_context>

<pallas_src>
import math

import jax
import jax.numpy as jnp
from jax import lax
from jax.experimental import pallas as pl
from jax.experimental.pallas import tpu as pltpu


THRESH = 0.3
TAU_M = 0.83
VRESET = 0.0                      # module default; "- spike * vreset" vanishes
ALPHA = math.exp(-1.0 / TAU_M)    # same scalar tau for hidden & output


def _round_up(n, m):
    return ((n + m - 1) // m) * m


def _rsnn_kernel(x_ref, w_ih_ref, w_r_ref, out_ref, a_scr):
    """x_ref   : (win*Bp, Ip)    bf16  time-major spike window, flattened
       w_ih_ref: (Ip, Hp)        bf16  input->hidden weights, (in, out) layout
       w_r_ref : (Hp, Hp + Op)   bf16  fused [w_hh | w_ho], (in, out) layout
       out_ref : (Bp, Op)        f32   o_sumspike / win
       a_scr   : (win*Bp, Hp)    f32   VMEM scratch: hoisted input projection
    """
    TB, _ = x_ref.shape
    H = w_ih_ref.shape[1]
    B, Op = out_ref.shape
    win = TB // B

    # ---- Prologue: time-independent input projection, one big MXU pass ----
    a_scr[...] = jnp.dot(x_ref[...], w_ih_ref[...],
                         preferred_element_type=jnp.float32)

    def step(t, carry):
        # b_in = h_spk_{t-1} @ w_hh, carried from the previous step's fused
        # matmul (zero at t == 0 since h_spk_{-1} == 0).
        h_mem, b_in, o_mem, o_sum = carry

        start = pl.multiple_of(t * B, B)
        a = a_scr[pl.ds(start, B), :]                       # (B, H) f32

        # --- mem_update_rnn (hidden layer) ---
        # h_mem is already zeroed wherever h_spk_{t-1} == 1 (post-reset) and
        # vreset == 0, so  mem*alpha*(1-spk) - spk*vreset == alpha*mem.
        mem_h = a + b_in + ALPHA * h_mem
        h_spk = (mem_h > THRESH).astype(jnp.bfloat16)       # exact 0/1, MXU LHS
        new_h_mem = jnp.where(mem_h < THRESH, mem_h, 0.0)

        # --- single fused matmul per step: h_spk_t @ [w_hh | w_ho] ---
        bc = jnp.dot(h_spk, w_r_ref[...],
                     preferred_element_type=jnp.float32)    # (B, H + Op)
        b_next = bc[:, :H]                                  # fc_hh for step t+1
        c = bc[:, H:]                                       # fc_ho for step t

        # --- mem_update (output layer) ---
        mem_o = ALPHA * o_mem + c
        o_spk = (mem_o > THRESH).astype(jnp.float32)
        new_o_mem = jnp.where(mem_o < THRESH, mem_o, 0.0)

        return (new_h_mem, b_next, new_o_mem, o_sum + o_spk)

    init = (jnp.zeros((B, H), jnp.float32),    # h_mem
            jnp.zeros((B, H), jnp.float32),    # recurrent drive (h_spk_{-1}=0)
            jnp.zeros((B, Op), jnp.float32),   # o_mem
            jnp.zeros((B, Op), jnp.float32))   # o_sumspike

    carry = lax.fori_loop(0, win, step, init, unroll=min(win, 8))
    out_ref[...] = carry[3] * (1.0 / win)


def rsnn_forward(x_btI, w_ih, w_hh, w_ho):
    """x_btI: (batch, win, num_input) float32 spikes.
    w_ih: (H, I), w_hh: (H, H), w_ho: (O, H)  (PyTorch Linear layout).
    Returns (batch, num_output) = o_sumspike / win.
    """
    B, win, I = x_btI.shape
    H = w_ih.shape[0]
    O = w_ho.shape[0]

    # Pad to TPU-friendly shapes: batch -> multiple of 16 (bf16 sublane
    # packing), feature dims -> multiples of 128 (lanes).  Zero padding is
    # exact (padded hidden units never spike, padded outputs stay 0).
    Bp = _round_up(B, 16)
    Ip = _round_up(I, 128)
    Hp = _round_up(H, 128)
    Op = _round_up(O, 128)

    # Time-major bf16 input (binary spikes are exact in bf16), flattened to
    # (win*Bp, Ip) so the kernel needs no reshapes.
    x_tbi = jnp.transpose(x_btI, (1, 0, 2)).astype(jnp.bfloat16)
    x_tbi = jnp.pad(x_tbi, ((0, 0), (0, Bp - B), (0, Ip - I)))
    x_2d = x_tbi.reshape(win * Bp, Ip)

    # Weights transposed to (in, out), zero-padded, cast to bf16.
    w_ih_t = jnp.pad(jnp.transpose(w_ih), ((0, Ip - I), (0, Hp - H))).astype(jnp.bfloat16)
    w_hh_t = jnp.pad(jnp.transpose(w_hh), ((0, Hp - H), (0, Hp - H))).astype(jnp.bfloat16)
    w_ho_t = jnp.pad(jnp.transpose(w_ho), ((0, Hp - H), (0, Op - O))).astype(jnp.bfloat16)
    w_r = jnp.concatenate([w_hh_t, w_ho_t], axis=1)          # (Hp, Hp + Op)

    vmem_spec = pl.BlockSpec(memory_space=pltpu.MemorySpace.VMEM)

    out = pl.pallas_call(
        _rsnn_kernel,
        out_shape=jax.ShapeDtypeStruct((Bp, Op), jnp.float32),
        in_specs=[vmem_spec, vmem_spec, vmem_spec],
        out_specs=vmem_spec,
        scratch_shapes=[pltpu.VMEM((win * Bp, Hp), jnp.float32)],
    )(x_2d, w_ih_t, w_r)

    return out[:B, :O]


def rsnn_reference(x_btI, w_ih, w_hh, w_ho):
    """Pure-JAX reference mirroring the PyTorch forward, using the same
    bf16 matmul operands (f32 accumulation) as the kernel."""
    B, win, I = x_btI.shape
    H = w_ih.shape[0]
    O = w_ho.shape[0]

    w_ih_t = jnp.transpose(w_ih).astype(jnp.bfloat16)
    w_hh_t = jnp.transpose(w_hh).astype(jnp.bfloat16)
    w_ho_t = jnp.transpose(w_ho).astype(jnp.bfloat16)
    x_bf = x_btI.astype(jnp.bfloat16)

    h_mem = jnp.zeros((B, H), jnp.float32)
    h_spk = jnp.zeros((B, H), jnp.float32)
    o_mem = jnp.zeros((B, O), jnp.float32)
    o_spk = jnp.zeros((B, O), jnp.float32)
    o_sum = jnp.zeros((B, O), jnp.float32)

    for t in range(win):
        x = x_bf[:, t, :]
        a = jnp.dot(x, w_ih_t, preferred_element_type=jnp.float32)
        b = jnp.dot(h_spk.astype(jnp.bfloat16), w_hh_t,
                    preferred_element_type=jnp.float32)
        c = h_mem * ALPHA * (1.0 - h_spk) - h_spk * VRESET
        mem = a + b + c
        h_spk = (mem > THRESH).astype(jnp.float32)
        h_mem = mem * (mem < THRESH)

        mem_o = (o_mem * ALPHA * (1.0 - o_spk)
                 + jnp.dot(h_spk.astype(jnp.bfloat16), w_ho_t,
                           preferred_element_type=jnp.float32)
                 - o_spk * VRESET)
        o_spk = (mem_o > THRESH).astype(jnp.float32)
        o_mem = mem_o * (mem_o < THRESH)
        o_sum = o_sum + o_spk
    return o_sum / win


if __name__ == "__main__":
    # Small "custom" RSNN config: num_input=128, num_hidden=128, num_output=16
    B, WIN, NUM_IN, NUM_HID, NUM_OUT = 8, 8, 128, 128, 16

    key = jax.random.PRNGKey(0)
    kx, kih, khh, kho = jax.random.split(key, 4)

    # Binary spike input, shape (batch, win, num_input) like the PyTorch module.
    x = (jax.random.uniform(kx, (B, WIN, NUM_IN)) < 0.3).astype(jnp.float32)

    # Deterministic Linear-style init (uniform +- 1/sqrt(fan_in)), no bias.
    w_ih = jax.random.uniform(kih, (NUM_HID, NUM_IN), minval=-1.0, maxval=1.0) / jnp.sqrt(NUM_IN * 1.0)
    w_hh = jax.random.uniform(khh, (NUM_HID, NUM_HID), minval=-1.0, maxval=1.0) / jnp.sqrt(NUM_HID * 1.0)
    w_ho = jax.random.uniform(kho, (NUM_OUT, NUM_HID), minval=-1.0, maxval=1.0) / jnp.sqrt(NUM_HID * 1.0)

    out = jax.block_until_ready(rsnn_forward(x, w_ih, w_hh, w_ho))
    ref = jax.block_until_ready(rsnn_reference(x, w_ih, w_hh, w_ho))

    assert out.shape == (B, NUM_OUT)
    assert jnp.allclose(out, ref, atol=1e-4, rtol=1e-4), (out, ref)
    print("KERNEL_OK")
</pallas_src>

<mosaic_0001>
module attributes {stable_mosaic.version = 11 : i64} {
  func.func @_rsnn_kernel(%arg0: memref<128x128xbf16, #tpu.memory_space<vmem>>, %arg1: memref<128x128xbf16, #tpu.memory_space<vmem>>, %arg2: memref<128x256xbf16, #tpu.memory_space<vmem>>, %arg3: memref<16x128xf32, #tpu.memory_space<vmem>>, %arg4: memref<128x128xf32, #tpu.memory_space<vmem>>) attributes {dimension_semantics = [], scalar_prefetch = 0 : i64, scratch_operands = 1 : i64, tpu.core_type = #tpu.core_type<tc>} {
    %c0 = arith.constant 0 : index
    %c0_0 = arith.constant 0 : index
    %0 = vector.load %arg0[%c0, %c0_0] : memref<128x128xbf16, #tpu.memory_space<vmem>>, vector<128x128xbf16>
    %c0_1 = arith.constant 0 : index
    %c0_2 = arith.constant 0 : index
    %1 = vector.load %arg1[%c0_1, %c0_2] : memref<128x128xbf16, #tpu.memory_space<vmem>>, vector<128x128xbf16>
    %cst = arith.constant dense<0.000000e+00> : vector<128x128xf32>
    %2 = tpu.matmul %0, %1, %cst {dimension_numbers = #tpu.dot_dimension_numbers<[1], [0], [0], [1], [0, 0, 1, 1], [], []>} : vector<128x128xbf16>, vector<128x128xbf16>, vector<128x128xf32> -> vector<128x128xf32>
    %c0_3 = arith.constant 0 : index
    %c0_4 = arith.constant 0 : index
    %3 = vector.load %arg4[%c0_3, %c0_4] : memref<128x128xf32, #tpu.memory_space<vmem>>, vector<128x128xf32>
    tpu.vector_store %arg4[%c0_3, %c0_4], %2 {strides = array<i32>} : memref<128x128xf32, #tpu.memory_space<vmem>>, vector<128x128xf32>,
    %cst_5 = arith.constant 0.000000e+00 : f32
    %4 = vector.broadcast %cst_5 : f32 to vector<16x128xf32>
    %cst_6 = arith.constant 0.000000e+00 : f32
    %5 = vector.broadcast %cst_6 : f32 to vector<16x128xf32>
    %cst_7 = arith.constant 0.000000e+00 : f32
    %6 = vector.broadcast %cst_7 : f32 to vector<16x128xf32>
    %cst_8 = arith.constant 0.000000e+00 : f32
    %7 = vector.broadcast %cst_8 : f32 to vector<16x128xf32>
    %c0_i32 = arith.constant 0 : i32
    %c16_i32 = arith.constant 16 : i32
    %8 = arith.muli %c0_i32, %c16_i32 : i32
    %9 = tpu.assume_multiple %8, 16 : i32
    %10 = arith.index_cast %9 : i32 to index
    %c0_9 = arith.constant 0 : index
    %11 = vector.load %arg4[%10, %c0_9] : memref<128x128xf32, #tpu.memory_space<vmem>>, vector<16x128xf32>
    %12 = arith.addf %11, %5 : vector<16x128xf32>
    %cst_10 = arith.constant 0.299746156 : f32
    %13 = vector.broadcast %cst_10 : f32 to vector<16x128xf32>
    %14 = arith.mulf %13, %4 : vector<16x128xf32>
    %15 = arith.addf %12, %14 : vector<16x128xf32>
    %cst_11 = arith.constant 3.000000e-01 : f32
    %16 = vector.broadcast %cst_11 : f32 to vector<16x128xf32>
    %17 = arith.cmpf ogt, %15, %16 : vector<16x128xf32>
    %18 = arith.extui %17 : vector<16x128xi1> to vector<16x128xi32>
    %19 = arith.sitofp %18 : vector<16x128xi32> to vector<16x128xf32>
    %20 = arith.truncf %19 : vector<16x128xf32> to vector<16x128xbf16>
    %cst_12 = arith.constant 3.000000e-01 : f32
    %21 = vector.broadcast %cst_12 : f32 to vector<16x128xf32>
    %22 = arith.cmpf olt, %15, %21 : vector<16x128xf32>
    %cst_13 = arith.constant 0.000000e+00 : f32
    %23 = vector.broadcast %cst_13 : f32 to vector<16x128xf32>
    %24 = arith.select %22, %15, %23 : vector<16x128xi1>, vector<16x128xf32>
    %c0_14 = arith.constant 0 : index
    %c0_15 = arith.constant 0 : index
    %25 = vector.load %arg2[%c0_14, %c0_15] : memref<128x256xbf16, #tpu.memory_space<vmem>>, vector<128x256xbf16>
    %cst_16 = arith.constant dense<0.000000e+00> : vector<16x256xf32>
    %26 = tpu.matmul %20, %25, %cst_16 {dimension_numbers = #tpu.dot_dimension_numbers<[1], [0], [0], [1], [0, 0, 1, 1], [], []>} : vector<16x128xbf16>, vector<128x256xbf16>, vector<16x256xf32> -> vector<16x256xf32>
    %27 = vector.extract_strided_slice %26 {offsets = [0, 0], sizes = [16, 128], strides = [1, 1]} : vector<16x256xf32> to vector<16x128xf32>
    %28 = vector.extract_strided_slice %26 {offsets = [0, 128], sizes = [16, 128], strides = [1, 1]} : vector<16x256xf32> to vector<16x128xf32>
    %cst_17 = arith.constant 0.299746156 : f32
    %29 = vector.broadcast %cst_17 : f32 to vector<16x128xf32>
    %30 = arith.mulf %29, %6 : vector<16x128xf32>
    %31 = arith.addf %30, %28 : vector<16x128xf32>
    %cst_18 = arith.constant 3.000000e-01 : f32
    %32 = vector.broadcast %cst_18 : f32 to vector<16x128xf32>
    %33 = arith.cmpf ogt, %31, %32 : vector<16x128xf32>
    %34 = arith.extui %33 : vector<16x128xi1> to vector<16x128xi32>
    %35 = arith.sitofp %34 : vector<16x128xi32> to vector<16x128xf32>
    %cst_19 = arith.constant 3.000000e-01 : f32
    %36 = vector.broadcast %cst_19 : f32 to vector<16x128xf32>
    %37 = arith.cmpf olt, %31, %36 : vector<16x128xf32>
    %cst_20 = arith.constant 0.000000e+00 : f32
    %38 = vector.broadcast %cst_20 : f32 to vector<16x128xf32>
    %39 = arith.select %37, %31, %38 : vector<16x128xi1>, vector<16x128xf32>
    %40 = arith.addf %7, %35 : vector<16x128xf32>
    %c1_i32 = arith.constant 1 : i32
    %c16_i32_21 = arith.constant 16 : i32
    %41 = arith.muli %c1_i32, %c16_i32_21 : i32
    %42 = tpu.assume_multiple %41, 16 : i32
    %43 = arith.index_cast %42 : i32 to index
    %c0_22 = arith.constant 0 : index
    %44 = vector.load %arg4[%43, %c0_22] : memref<128x128xf32, #tpu.memory_space<vmem>>, vector<16x128xf32>
    %45 = arith.addf %44, %27 : vector<16x128xf32>
    %cst_23 = arith.constant 0.299746156 : f32
    %46 = vector.broadcast %cst_23 : f32 to vector<16x128xf32>
    %47 = arith.mulf %46, %24 : vector<16x128xf32>
    %48 = arith.addf %45, %47 : vector<16x128xf32>
    %cst_24 = arith.constant 3.000000e-01 : f32
    %49 = vector.broadcast %cst_24 : f32 to vector<16x128xf32>
    %50 = arith.cmpf ogt, %48, %49 : vector<16x128xf32>
    %51 = arith.extui %50 : vector<16x128xi1> to vector<16x128xi32>
    %52 = arith.sitofp %51 : vector<16x128xi32> to vector<16x128xf32>
    %53 = arith.truncf %52 : vector<16x128xf32> to vector<16x128xbf16>
    %cst_25 = arith.constant 3.000000e-01 : f32
    %54 = vector.broadcast %cst_25 : f32 to vector<16x128xf32>
    %55 = arith.cmpf olt, %48, %54 : vector<16x128xf32>
    %cst_26 = arith.constant 0.000000e+00 : f32
    %56 = vector.broadcast %cst_26 : f32 to vector<16x128xf32>
    %57 = arith.select %55, %48, %56 : vector<16x128xi1>, vector<16x128xf32>
    %c0_27 = arith.constant 0 : index
    %c0_28 = arith.constant 0 : index
    %58 = vector.load %arg2[%c0_27, %c0_28] : memref<128x256xbf16, #tpu.memory_space<vmem>>, vector<128x256xbf16>
    %cst_29 = arith.constant dense<0.000000e+00> : vector<16x256xf32>
    %59 = tpu.matmul %53, %58, %cst_29 {dimension_numbers = #tpu.dot_dimension_numbers<[1], [0], [0], [1], [0, 0, 1, 1], [], []>} : vector<16x128xbf16>, vector<128x256xbf16>, vector<16x256xf32> -> vector<16x256xf32>
    %60 = vector.extract_strided_slice %59 {offsets = [0, 0], sizes = [16, 128], strides = [1, 1]} : vector<16x256xf32> to vector<16x128xf32>
    %61 = vector.extract_strided_slice %59 {offsets = [0, 128], sizes = [16, 128], strides = [1, 1]} : vector<16x256xf32> to vector<16x128xf32>
    %cst_30 = arith.constant 0.299746156 : f32
    %62 = vector.broadcast %cst_30 : f32 to vector<16x128xf32>
    %63 = arith.mulf %62, %39 : vector<16x128xf32>
    %64 = arith.addf %63, %61 : vector<16x128xf32>
    %cst_31 = arith.constant 3.000000e-01 : f32
    %65 = vector.broadcast %cst_31 : f32 to vector<16x128xf32>
    %66 = arith.cmpf ogt, %64, %65 : vector<16x128xf32>
    %67 = arith.extui %66 : vector<16x128xi1> to vector<16x128xi32>
    %68 = arith.sitofp %67 : vector<16x128xi32> to vector<16x128xf32>
    %cst_32 = arith.constant 3.000000e-01 : f32
    %69 = vector.broadcast %cst_32 : f32 to vector<16x128xf32>
    %70 = arith.cmpf olt, %64, %69 : vector<16x128xf32>
    %cst_33 = arith.constant 0.000000e+00 : f32
    %71 = vector.broadcast %cst_33 : f32 to vector<16x128xf32>
    %72 = arith.select %70, %64, %71 : vector<16x128xi1>, vector<16x128xf32>
    %73 = arith.addf %40, %68 : vector<16x128xf32>
    %c2_i32 = arith.constant 2 : i32
    %c16_i32_34 = arith.constant 16 : i32
    %74 = arith.muli %c2_i32, %c16_i32_34 : i32
    %75 = tpu.assume_multiple %74, 16 : i32
    %76 = arith.index_cast %75 : i32 to index
    %c0_35 = arith.constant 0 : index
    %77 = vector.load %arg4[%76, %c0_35] : memref<128x128xf32, #tpu.memory_space<vmem>>, vector<16x128xf32>
    %78 = arith.addf %77, %60 : vector<16x128xf32>
    %cst_36 = arith.constant 0.299746156 : f32
    %79 = vector.broadcast %cst_36 : f32 to vector<16x128xf32>
    %80 = arith.mulf %79, %57 : vector<16x128xf32>
    %81 = arith.addf %78, %80 : vector<16x128xf32>
    %cst_37 = arith.constant 3.000000e-01 : f32
    %82 = vector.broadcast %cst_37 : f32 to vector<16x128xf32>
    %83 = arith.cmpf ogt, %81, %82 : vector<16x128xf32>
    %84 = arith.extui %83 : vector<16x128xi1> to vector<16x128xi32>
    %85 = arith.sitofp %84 : vector<16x128xi32> to vector<16x128xf32>
    %86 = arith.truncf %85 : vector<16x128xf32> to vector<16x128xbf16>
    %cst_38 = arith.constant 3.000000e-01 : f32
    %87 = vector.broadcast %cst_38 : f32 to vector<16x128xf32>
    %88 = arith.cmpf olt, %81, %87 : vector<16x128xf32>
    %cst_39 = arith.constant 0.000000e+00 : f32
    %89 = vector.broadcast %cst_39 : f32 to vector<16x128xf32>
    %90 = arith.select %88, %81, %89 : vector<16x128xi1>, vector<16x128xf32>
    %c0_40 = arith.constant 0 : index
    %c0_41 = arith.constant 0 : index
    %91 = vector.load %arg2[%c0_40, %c0_41] : memref<128x256xbf16, #tpu.memory_space<vmem>>, vector<128x256xbf16>
    %cst_42 = arith.constant dense<0.000000e+00> : vector<16x256xf32>
    %92 = tpu.matmul %86, %91, %cst_42 {dimension_numbers = #tpu.dot_dimension_numbers<[1], [0], [0], [1], [0, 0, 1, 1], [], []>} : vector<16x128xbf16>, vector<128x256xbf16>, vector<16x256xf32> -> vector<16x256xf32>
    %93 = vector.extract_strided_slice %92 {offsets = [0, 0], sizes = [16, 128], strides = [1, 1]} : vector<16x256xf32> to vector<16x128xf32>
    %94 = vector.extract_strided_slice %92 {offsets = [0, 128], sizes = [16, 128], strides = [1, 1]} : vector<16x256xf32> to vector<16x128xf32>
    %cst_43 = arith.constant 0.299746156 : f32
    %95 = vector.broadcast %cst_43 : f32 to vector<16x128xf32>
    %96 = arith.mulf %95, %72 : vector<16x128xf32>
    %97 = arith.addf %96, %94 : vector<16x128xf32>
    %cst_44 = arith.constant 3.000000e-01 : f32
    %98 = vector.broadcast %cst_44 : f32 to vector<16x128xf32>
    %99 = arith.cmpf ogt, %97, %98 : vector<16x128xf32>
    %100 = arith.extui %99 : vector<16x128xi1> to vector<16x128xi32>
    %101 = arith.sitofp %100 : vector<16x128xi32> to vector<16x128xf32>
    %cst_45 = arith.constant 3.000000e-01 : f32
    %102 = vector.broadcast %cst_45 : f32 to vector<16x128xf32>
    %103 = arith.cmpf olt, %97, %102 : vector<16x128xf32>
    %cst_46 = arith.constant 0.000000e+00 : f32
    %104 = vector.broadcast %cst_46 : f32 to vector<16x128xf32>
    %105 = arith.select %103, %97, %104 : vector<16x128xi1>, vector<16x128xf32>
    %106 = arith.addf %73, %101 : vector<16x128xf32>
    %c3_i32 = arith.constant 3 : i32
    %c16_i32_47 = arith.constant 16 : i32
    %107 = arith.muli %c3_i32, %c16_i32_47 : i32
    %108 = tpu.assume_multiple %107, 16 : i32
    %109 = arith.index_cast %108 : i32 to index
    %c0_48 = arith.constant 0 : index
    %110 = vector.load %arg4[%109, %c0_48] : memref<128x128xf32, #tpu.memory_space<vmem>>, vector<16x128xf32>
    %111 = arith.addf %110, %93 : vector<16x128xf32>
    %cst_49 = arith.constant 0.299746156 : f32
    %112 = vector.broadcast %cst_49 : f32 to vector<16x128xf32>
    %113 = arith.mulf %112, %90 : vector<16x128xf32>
    %114 = arith.addf %111, %113 : vector<16x128xf32>
    %cst_50 = arith.constant 3.000000e-01 : f32
    %115 = vector.broadcast %cst_50 : f32 to vector<16x128xf32>
    %116 = arith.cmpf ogt, %114, %115 : vector<16x128xf32>
    %117 = arith.extui %116 : vector<16x128xi1> to vector<16x128xi32>
    %118 = arith.sitofp %117 : vector<16x128xi32> to vector<16x128xf32>
    %119 = arith.truncf %118 : vector<16x128xf32> to vector<16x128xbf16>
    %cst_51 = arith.constant 3.000000e-01 : f32
    %120 = vector.broadcast %cst_51 : f32 to vector<16x128xf32>
    %121 = arith.cmpf olt, %114, %120 : vector<16x128xf32>
    %cst_52 = arith.constant 0.000000e+00 : f32
    %122 = vector.broadcast %cst_52 : f32 to vector<16x128xf32>
    %123 = arith.select %121, %114, %122 : vector<16x128xi1>, vector<16x128xf32>
    %c0_53 = arith.constant 0 : index
    %c0_54 = arith.constant 0 : index
    %124 = vector.load %arg2[%c0_53, %c0_54] : memref<128x256xbf16, #tpu.memory_space<vmem>>, vector<128x256xbf16>
    %cst_55 = arith.constant dense<0.000000e+00> : vector<16x256xf32>
    %125 = tpu.matmul %119, %124, %cst_55 {dimension_numbers = #tpu.dot_dimension_numbers<[1], [0], [0], [1], [0, 0, 1, 1], [], []>} : vector<16x128xbf16>, vector<128x256xbf16>, vector<16x256xf32> -> vector<16x256xf32>
    %126 = vector.extract_strided_slice %125 {offsets = [0, 0], sizes = [16, 128], strides = [1, 1]} : vector<16x256xf32> to vector<16x128xf32>
    %127 = vector.extract_strided_slice %125 {offsets = [0, 128], sizes = [16, 128], strides = [1, 1]} : vector<16x256xf32> to vector<16x128xf32>
    %cst_56 = arith.constant 0.299746156 : f32
    %128 = vector.broadcast %cst_56 : f32 to vector<16x128xf32>
    %129 = arith.mulf %128, %105 : vector<16x128xf32>
    %130 = arith.addf %129, %127 : vector<16x128xf32>
    %cst_57 = arith.constant 3.000000e-01 : f32
    %131 = vector.broadcast %cst_57 : f32 to vector<16x128xf32>
    %132 = arith.cmpf ogt, %130, %131 : vector<16x128xf32>
    %133 = arith.extui %132 : vector<16x128xi1> to vector<16x128xi32>
    %134 = arith.sitofp %133 : vector<16x128xi32> to vector<16x128xf32>
    %cst_58 = arith.constant 3.000000e-01 : f32
    %135 = vector.broadcast %cst_58 : f32 to vector<16x128xf32>
    %136 = arith.cmpf olt, %130, %135 : vector<16x128xf32>
    %cst_59 = arith.constant 0.000000e+00 : f32
    %137 = vector.broadcast %cst_59 : f32 to vector<16x128xf32>
    %138 = arith.select %136, %130, %137 : vector<16x128xi1>, vector<16x128xf32>
    %139 = arith.addf %106, %134 : vector<16x128xf32>
    %c4_i32 = arith.constant 4 : i32
    %c16_i32_60 = arith.constant 16 : i32
    %140 = arith.muli %c4_i32, %c16_i32_60 : i32
    %141 = tpu.assume_multiple %140, 16 : i32
    %142 = arith.index_cast %141 : i32 to index
    %c0_61 = arith.constant 0 : index
    %143 = vector.load %arg4[%142, %c0_61] : memref<128x128xf32, #tpu.memory_space<vmem>>, vector<16x128xf32>
    %144 = arith.addf %143, %126 : vector<16x128xf32>
    %cst_62 = arith.constant 0.299746156 : f32
    %145 = vector.broadcast %cst_62 : f32 to vector<16x128xf32>
    %146 = arith.mulf %145, %123 : vector<16x128xf32>
    %147 = arith.addf %144, %146 : vector<16x128xf32>
    %cst_63 = arith.constant 3.000000e-01 : f32
    %148 = vector.broadcast %cst_63 : f32 to vector<16x128xf32>
    %149 = arith.cmpf ogt, %147, %148 : vector<16x128xf32>
    %150 = arith.extui %149 : vector<16x128xi1> to vector<16x128xi32>
    %151 = arith.sitofp %150 : vector<16x128xi32> to vector<16x128xf32>
    %152 = arith.truncf %151 : vector<16x128xf32> to vector<16x128xbf16>
    %cst_64 = arith.constant 3.000000e-01 : f32
    %153 = vector.broadcast %cst_64 : f32 to vector<16x128xf32>
    %154 = arith.cmpf olt, %147, %153 : vector<16x128xf32>
    %cst_65 = arith.constant 0.000000e+00 : f32
    %155 = vector.broadcast %cst_65 : f32 to vector<16x128xf32>
    %156 = arith.select %154, %147, %155 : vector<16x128xi1>, vector<16x128xf32>
    %c0_66 = arith.constant 0 : index
    %c0_67 = arith.constant 0 : index
    %157 = vector.load %arg2[%c0_66, %c0_67] : memref<128x256xbf16, #tpu.memory_space<vmem>>, vector<128x256xbf16>
    %cst_68 = arith.constant dense<0.000000e+00> : vector<16x256xf32>
    %158 = tpu.matmul %152, %157, %cst_68 {dimension_numbers = #tpu.dot_dimension_numbers<[1], [0], [0], [1], [0, 0, 1, 1], [], []>} : vector<16x128xbf16>, vector<128x256xbf16>, vector<16x256xf32> -> vector<16x256xf32>
    %159 = vector.extract_strided_slice %158 {offsets = [0, 0], sizes = [16, 128], strides = [1, 1]} : vector<16x256xf32> to vector<16x128xf32>
    %160 = vector.extract_strided_slice %158 {offsets = [0, 128], sizes = [16, 128], strides = [1, 1]} : vector<16x256xf32> to vector<16x128xf32>
    %cst_69 = arith.constant 0.299746156 : f32
    %161 = vector.broadcast %cst_69 : f32 to vector<16x128xf32>
    %162 = arith.mulf %161, %138 : vector<16x128xf32>
    %163 = arith.addf %162, %160 : vector<16x128xf32>
    %cst_70 = arith.constant 3.000000e-01 : f32
    %164 = vector.broadcast %cst_70 : f32 to vector<16x128xf32>
    %165 = arith.cmpf ogt, %163, %164 : vector<16x128xf32>
    %166 = arith.extui %165 : vector<16x128xi1> to vector<16x128xi32>
    %167 = arith.sitofp %166 : vector<16x128xi32> to vector<16x128xf32>
    %cst_71 = arith.constant 3.000000e-01 : f32
    %168 = vector.broadcast %cst_71 : f32 to vector<16x128xf32>
    %169 = arith.cmpf olt, %163, %168 : vector<16x128xf32>
    %cst_72 = arith.constant 0.000000e+00 : f32
    %170 = vector.broadcast %cst_72 : f32 to vector<16x128xf32>
    %171 = arith.select %169, %163, %170 : vector<16x128xi1>, vector<16x128xf32>
    %172 = arith.addf %139, %167 : vector<16x128xf32>
    %c5_i32 = arith.constant 5 : i32
    %c16_i32_73 = arith.constant 16 : i32
    %173 = arith.muli %c5_i32, %c16_i32_73 : i32
    %174 = tpu.assume_multiple %173, 16 : i32
    %175 = arith.index_cast %174 : i32 to index
    %c0_74 = arith.constant 0 : index
    %176 = vector.load %arg4[%175, %c0_74] : memref<128x128xf32, #tpu.memory_space<vmem>>, vector<16x128xf32>
    %177 = arith.addf %176, %159 : vector<16x128xf32>
    %cst_75 = arith.constant 0.299746156 : f32
    %178 = vector.broadcast %cst_75 : f32 to vector<16x128xf32>
    %179 = arith.mulf %178, %156 : vector<16x128xf32>
    %180 = arith.addf %177, %179 : vector<16x128xf32>
    %cst_76 = arith.constant 3.000000e-01 : f32
    %181 = vector.broadcast %cst_76 : f32 to vector<16x128xf32>
    %182 = arith.cmpf ogt, %180, %181 : vector<16x128xf32>
    %183 = arith.extui %182 : vector<16x128xi1> to vector<16x128xi32>
    %184 = arith.sitofp %183 : vector<16x128xi32> to vector<16x128xf32>
    %185 = arith.truncf %184 : vector<16x128xf32> to vector<16x128xbf16>
    %cst_77 = arith.constant 3.000000e-01 : f32
    %186 = vector.broadcast %cst_77 : f32 to vector<16x128xf32>
    %187 = arith.cmpf olt, %180, %186 : vector<16x128xf32>
    %cst_78 = arith.constant 0.000000e+00 : f32
    %188 = vector.broadcast %cst_78 : f32 to vector<16x128xf32>
    %189 = arith.select %187, %180, %188 : vector<16x128xi1>, vector<16x128xf32>
    %c0_79 = arith.constant 0 : index
    %c0_80 = arith.constant 0 : index
    %190 = vector.load %arg2[%c0_79, %c0_80] : memref<128x256xbf16, #tpu.memory_space<vmem>>, vector<128x256xbf16>
    %cst_81 = arith.constant dense<0.000000e+00> : vector<16x256xf32>
    %191 = tpu.matmul %185, %190, %cst_81 {dimension_numbers = #tpu.dot_dimension_numbers<[1], [0], [0], [1], [0, 0, 1, 1], [], []>} : vector<16x128xbf16>, vector<128x256xbf16>, vector<16x256xf32> -> vector<16x256xf32>
    %192 = vector.extract_strided_slice %191 {offsets = [0, 0], sizes = [16, 128], strides = [1, 1]} : vector<16x256xf32> to vector<16x128xf32>
    %193 = vector.extract_strided_slice %191 {offsets = [0, 128], sizes = [16, 128], strides = [1, 1]} : vector<16x256xf32> to vector<16x128xf32>
    %cst_82 = arith.constant 0.299746156 : f32
    %194 = vector.broadcast %cst_82 : f32 to vector<16x128xf32>
    %195 = arith.mulf %194, %171 : vector<16x128xf32>
    %196 = arith.addf %195, %193 : vector<16x128xf32>
    %cst_83 = arith.constant 3.000000e-01 : f32
    %197 = vector.broadcast %cst_83 : f32 to vector<16x128xf32>
    %198 = arith.cmpf ogt, %196, %197 : vector<16x128xf32>
    %199 = arith.extui %198 : vector<16x128xi1> to vector<16x128xi32>
    %200 = arith.sitofp %199 : vector<16x128xi32> to vector<16x128xf32>
    %cst_84 = arith.constant 3.000000e-01 : f32
    %201 = vector.broadcast %cst_84 : f32 to vector<16x128xf32>
    %202 = arith.cmpf olt, %196, %201 : vector<16x128xf32>
    %cst_85 = arith.constant 0.000000e+00 : f32
    %203 = vector.broadcast %cst_85 : f32 to vector<16x128xf32>
    %204 = arith.select %202, %196, %203 : vector<16x128xi1>, vector<16x128xf32>
    %205 = arith.addf %172, %200 : vector<16x128xf32>
    %c6_i32 = arith.constant 6 : i32
    %c16_i32_86 = arith.constant 16 : i32
    %206 = arith.muli %c6_i32, %c16_i32_86 : i32
    %207 = tpu.assume_multiple %206, 16 : i32
    %208 = arith.index_cast %207 : i32 to index
    %c0_87 = arith.constant 0 : index
    %209 = vector.load %arg4[%208, %c0_87] : memref<128x128xf32, #tpu.memory_space<vmem>>, vector<16x128xf32>
    %210 = arith.addf %209, %192 : vector<16x128xf32>
    %cst_88 = arith.constant 0.299746156 : f32
    %211 = vector.broadcast %cst_88 : f32 to vector<16x128xf32>
    %212 = arith.mulf %211, %189 : vector<16x128xf32>
    %213 = arith.addf %210, %212 : vector<16x128xf32>
    %cst_89 = arith.constant 3.000000e-01 : f32
    %214 = vector.broadcast %cst_89 : f32 to vector<16x128xf32>
    %215 = arith.cmpf ogt, %213, %214 : vector<16x128xf32>
    %216 = arith.extui %215 : vector<16x128xi1> to vector<16x128xi32>
    %217 = arith.sitofp %216 : vector<16x128xi32> to vector<16x128xf32>
    %218 = arith.truncf %217 : vector<16x128xf32> to vector<16x128xbf16>
    %cst_90 = arith.constant 3.000000e-01 : f32
    %219 = vector.broadcast %cst_90 : f32 to vector<16x128xf32>
    %220 = arith.cmpf olt, %213, %219 : vector<16x128xf32>
    %cst_91 = arith.constant 0.000000e+00 : f32
    %221 = vector.broadcast %cst_91 : f32 to vector<16x128xf32>
    %222 = arith.select %220, %213, %221 : vector<16x128xi1>, vector<16x128xf32>
    %c0_92 = arith.constant 0 : index
    %c0_93 = arith.constant 0 : index
    %223 = vector.load %arg2[%c0_92, %c0_93] : memref<128x256xbf16, #tpu.memory_space<vmem>>, vector<128x256xbf16>
    %cst_94 = arith.constant dense<0.000000e+00> : vector<16x256xf32>
    %224 = tpu.matmul %218, %223, %cst_94 {dimension_numbers = #tpu.dot_dimension_numbers<[1], [0], [0], [1], [0, 0, 1, 1], [], []>} : vector<16x128xbf16>, vector<128x256xbf16>, vector<16x256xf32> -> vector<16x256xf32>
    %225 = vector.extract_strided_slice %224 {offsets = [0, 0], sizes = [16, 128], strides = [1, 1]} : vector<16x256xf32> to vector<16x128xf32>
    %226 = vector.extract_strided_slice %224 {offsets = [0, 128], sizes = [16, 128], strides = [1, 1]} : vector<16x256xf32> to vector<16x128xf32>
    %cst_95 = arith.constant 0.299746156 : f32
    %227 = vector.broadcast %cst_95 : f32 to vector<16x128xf32>
    %228 = arith.mulf %227, %204 : vector<16x128xf32>
    %229 = arith.addf %228, %226 : vector<16x128xf32>
    %cst_96 = arith.constant 3.000000e-01 : f32
    %230 = vector.broadcast %cst_96 : f32 to vector<16x128xf32>
    %231 = arith.cmpf ogt, %229, %230 : vector<16x128xf32>
    %232 = arith.extui %231 : vector<16x128xi1> to vector<16x128xi32>
    %233 = arith.sitofp %232 : vector<16x128xi32> to vector<16x128xf32>
    %cst_97 = arith.constant 3.000000e-01 : f32
    %234 = vector.broadcast %cst_97 : f32 to vector<16x128xf32>
    %235 = arith.cmpf olt, %229, %234 : vector<16x128xf32>
    %cst_98 = arith.constant 0.000000e+00 : f32
    %236 = vector.broadcast %cst_98 : f32 to vector<16x128xf32>
    %237 = arith.select %235, %229, %236 : vector<16x128xi1>, vector<16x128xf32>
    %238 = arith.addf %205, %233 : vector<16x128xf32>
    %c7_i32 = arith.constant 7 : i32
    %c16_i32_99 = arith.constant 16 : i32
    %239 = arith.muli %c7_i32, %c16_i32_99 : i32
    %240 = tpu.assume_multiple %239, 16 : i32
    %241 = arith.index_cast %240 : i32 to index
    %c0_100 = arith.constant 0 : index
    %242 = vector.load %arg4[%241, %c0_100] : memref<128x128xf32, #tpu.memory_space<vmem>>, vector<16x128xf32>
    %243 = arith.addf %242, %225 : vector<16x128xf32>
    %cst_101 = arith.constant 0.299746156 : f32
    %244 = vector.broadcast %cst_101 : f32 to vector<16x128xf32>
    %245 = arith.mulf %244, %222 : vector<16x128xf32>
    %246 = arith.addf %243, %245 : vector<16x128xf32>
    %cst_102 = arith.constant 3.000000e-01 : f32
    %247 = vector.broadcast %cst_102 : f32 to vector<16x128xf32>
    %248 = arith.cmpf ogt, %246, %247 : vector<16x128xf32>
    %249 = arith.extui %248 : vector<16x128xi1> to vector<16x128xi32>
    %250 = arith.sitofp %249 : vector<16x128xi32> to vector<16x128xf32>
    %251 = arith.truncf %250 : vector<16x128xf32> to vector<16x128xbf16>
    %cst_103 = arith.constant 3.000000e-01 : f32
    %252 = vector.broadcast %cst_103 : f32 to vector<16x128xf32>
    %253 = arith.cmpf olt, %246, %252 : vector<16x128xf32>
    %cst_104 = arith.constant 0.000000e+00 : f32
    %254 = vector.broadcast %cst_104 : f32 to vector<16x128xf32>
    %255 = arith.select %253, %246, %254 : vector<16x128xi1>, vector<16x128xf32>
    %c0_105 = arith.constant 0 : index
    %c0_106 = arith.constant 0 : index
    %256 = vector.load %arg2[%c0_105, %c0_106] : memref<128x256xbf16, #tpu.memory_space<vmem>>, vector<128x256xbf16>
    %cst_107 = arith.constant dense<0.000000e+00> : vector<16x256xf32>
    %257 = tpu.matmul %251, %256, %cst_107 {dimension_numbers = #tpu.dot_dimension_numbers<[1], [0], [0], [1], [0, 0, 1, 1], [], []>} : vector<16x128xbf16>, vector<128x256xbf16>, vector<16x256xf32> -> vector<16x256xf32>
    %258 = vector.extract_strided_slice %257 {offsets = [0, 0], sizes = [16, 128], strides = [1, 1]} : vector<16x256xf32> to vector<16x128xf32>
    %259 = vector.extract_strided_slice %257 {offsets = [0, 128], sizes = [16, 128], strides = [1, 1]} : vector<16x256xf32> to vector<16x128xf32>
    %cst_108 = arith.constant 0.299746156 : f32
    %260 = vector.broadcast %cst_108 : f32 to vector<16x128xf32>
    %261 = arith.mulf %260, %237 : vector<16x128xf32>
    %262 = arith.addf %261, %259 : vector<16x128xf32>
    %cst_109 = arith.constant 3.000000e-01 : f32
    %263 = vector.broadcast %cst_109 : f32 to vector<16x128xf32>
    %264 = arith.cmpf ogt, %262, %263 : vector<16x128xf32>
    %265 = arith.extui %264 : vector<16x128xi1> to vector<16x128xi32>
    %266 = arith.sitofp %265 : vector<16x128xi32> to vector<16x128xf32>
    %cst_110 = arith.constant 3.000000e-01 : f32
    %267 = vector.broadcast %cst_110 : f32 to vector<16x128xf32>
    %268 = arith.cmpf olt, %262, %267 : vector<16x128xf32>
    %cst_111 = arith.constant 0.000000e+00 : f32
    %269 = vector.broadcast %cst_111 : f32 to vector<16x128xf32>
    %270 = arith.select %268, %262, %269 : vector<16x128xi1>, vector<16x128xf32>
    %271 = arith.addf %238, %266 : vector<16x128xf32>
    %c8_i32 = arith.constant 8 : i32
    %cst_112 = arith.constant 1.250000e-01 : f32
    %272 = vector.broadcast %cst_112 : f32 to vector<16x128xf32>
    %273 = arith.mulf %271, %272 : vector<16x128xf32>
    %c0_113 = arith.constant 0 : index
    %c0_114 = arith.constant 0 : index
    %274 = vector.load %arg3[%c0_113, %c0_114] : memref<16x128xf32, #tpu.memory_space<vmem>>, vector<16x128xf32>
    tpu.vector_store %arg3[%c0_113, %c0_114], %273 {strides = array<i32>} : memref<16x128xf32, #tpu.memory_space<vmem>>, vector<16x128xf32>,
    return
  }
}

</mosaic_0001>

<bundles_post_ra>
// kernel: tpu_custom_call.1
= control target key start
LH: loop header
LB: loop body
LE: loop exit
PB: predicated region body
PF: predicated region fallthrough
CT: control target
= control target key end

     0   :  { %8 = vsyncpa [#allocation4], 0  ;;  %s1620_s0 = inlined_call_operand.hbm [shape: bf16[128,128], index: 0, kind: input, shape index: {}]   ;;  %s1621_s1 = inlined_call_operand.hbm [shape: bf16[128,128], index: 1, kind: input, shape index: {}]   ;;  %s1622_s2 = inlined_call_operand.hbm [shape: bf16[128,256], index: 2, kind: input, shape index: {}]   ;;  %s1623_s3 = inlined_call_operand.hbm [shape: f32[16,128], index: 3, kind: output, shape index: {}]  }
   0x1   :  { %9 = vsyncpa [#allocation7], 0 }
   0x2   :  { %10 = vsyncpa [#allocation5], 0  ;;  %s1306_s12 = smov [#allocation6]   ;;  %s1307_s14 = smov [#allocation3]  }
   0x3   :  { %s28_s13 = sshll.u32 %s1306_s12, 4  ;;  %s16_s15 = sshll.u32 %s1307_s14, 4  ;;  %s29_s13 = int_to_ptr.vmem [resolvable:$true] %s28_s13  ;;  %s1337_s15 = int_to_ptr.vmem [resolvable:$true] %s16_s15 }
   0x4   :  { %s1212_s18 = scalar_lea.hbm %s1621_s1, 1024 }
   0x5   :  { %p1213_p0 = scmp.ne.s32.totalorder %s1621_s1, %s1212_s18  ;;  %p1216_p1 = scmp.lt.u32.totalorder %s1212_s18, %s1621_s1 }
   0x7   :  { %p1218_p2 = pnand %p1216_p1, %p1213_p0 }
   0x9   :  { %1221 = shalt.err (!%p1218_p2)
}
   0xa   :  { %s1222_s23 = scalar_lea.vmem %s29_s13, 1024  ;;  %p1227_p4 = scmp.lt.s32.totalorder %s29_s13, %s29_s13 }
   0xb   :  { %p1223_p3 = scmp.ne.s32.totalorder %s29_s13, %s1222_s23  ;;  %p1228_p5 = scmp.lt.s32.totalorder %s1222_s23, %s1222_s23 }
   0xd   :  { %p1229_p6 = por %p1228_p5, %p1227_p4 }
   0xf   :  { %p1230_p7 = pnand %p1229_p6, %p1223_p3 }
  0x11   :  { %1233 = shalt.err (!%p1230_p7)
}
  0x12   :  { %s1308_s24 = smov 64   ;;  %s1309_s25 = smov 4  }
  0x13   :  { %34 = dma.hbm_to_vmem [thread:$0]  %s1621_s1, 1024, %s29_s13, [#allocation7], %s1308_s24, %s1308_s24, %s1309_s25  }
  0x14   :  { %s1234_s30 = scalar_lea.hbm %s1620_s0, 1024 }
  0x15   :  { %p1235_p8 = scmp.ne.s32.totalorder %s1620_s0, %s1234_s30  ;;  %p1238_p9 = scmp.lt.u32.totalorder %s1234_s30, %s1620_s0 }
  0x17   :  { %p1240_p10 = pnand %p1238_p9, %p1235_p8 }
  0x19   :  { %1243 = shalt.err (!%p1240_p10)
}
  0x1a   :  { %s1244_s8 = scalar_lea.vmem %s1337_s15, 1024  ;;  %p1249_p12 = scmp.lt.s32.totalorder %s1337_s15, %s1337_s15 }
  0x1b   :  { %p1245_p11 = scmp.ne.s32.totalorder %s1337_s15, %s1244_s8  ;;  %p1250_p13 = scmp.lt.s32.totalorder %s1244_s8, %s1244_s8 }
  0x1d   :  { %p1251_p0 = por %p1250_p13, %p1249_p12 }
  0x1f   :  { %p1252_p1 = pnand %p1251_p0, %p1245_p11 }
  0x21   :  { %1255 = shalt.err (!%p1252_p1)
}
  0x22   :  { %22 = dma.hbm_to_vmem [thread:$0]  %s1620_s0, 1024, %s1337_s15, [#allocation4], %s1308_s24, %s1308_s24, %s1309_s25  }
  0x23   :  { %s1310_s10 = smov [#allocation8]   ;;  %s1256_s14 = scalar_lea.hbm %s1622_s2, 2048 }
  0x24   :  { %s40_s11 = sshll.u32 %s1310_s10, 4  ;;  %p1257_p2 = scmp.ne.s32.totalorder %s1622_s2, %s1256_s14  ;;  %s41_s11 = int_to_ptr.vmem [resolvable:$true] %s40_s11 }
  0x25   :  { %p1260_p3 = scmp.lt.u32.totalorder %s1256_s14, %s1622_s2 }
  0x27   :  { %p1262_p4 = pnand %p1260_p3, %p1257_p2 }
  0x29   :  { %1265 = shalt.err (!%p1262_p4)
}
  0x2a   :  { %s1266_s20 = scalar_lea.vmem %s41_s11, 2048  ;;  %p1271_p6 = scmp.lt.s32.totalorder %s41_s11, %s41_s11 }
  0x2b   :  { %p1267_p5 = scmp.ne.s32.totalorder %s41_s11, %s1266_s20  ;;  %p1272_p7 = scmp.lt.s32.totalorder %s1266_s20, %s1266_s20 }
  0x2d   :  { %p1273_p8 = por %p1272_p7, %p1271_p6 }
  0x2f   :  { %p1274_p9 = pnand %p1273_p8, %p1267_p5 }
  0x31   :  { %1277 = shalt.err (!%p1274_p9)
}
  0x32   :  { %s1311_s0 = smov 128   ;;  %s1312_s15 = smov 8  }
  0x33   :  { %46 = dma.hbm_to_vmem [thread:$0]  %s1622_s2, 2048, %s41_s11, [#allocation7], %s1311_s0, %s1311_s0, %s1312_s15  }
  0x34   :  { %1300 = dma.done.wait [#allocation4], 1024  }
  0x35   :  { %1301 = vsyncadd [#allocation4], 4294966272 }
  0x36   :  { %1302 = dma.done.wait [#allocation7], 3072  }
  0x37   :  { %1303 = vsyncadd [#allocation7], 4294964224  ;;  %v1172_v0 = vld [vmem:[#allocation6] sm:$0xff]   ;;  %v1173_v1 = vld [vmem:[#allocation6 + $0x8] sm:$0xff]   ;;  %v1313_v26 = vmov 0   ;;  %s1316_s2 = smov [#allocation9]  }
  0x38   :  { %1129 = vmatprep.subr.bf16.mxu0 %v1172_v0  ;;  %v1174_v2 = vld [vmem:[#allocation6 + $0x10] sm:$0xff]   ;;  %v1175_v3 = vld [vmem:[#allocation6 + $0x18] sm:$0xff]   ;;  %v1180_v4 = vld [vmem:[#allocation3] sm:$0xff]   ;;  %443 = vmatprep.mubr.bf16.mxu1 %v1313_v26  ;;  %v1314_v37 = vmov 1.0|1.0   ;;  %s1020_s23 = sshll.u32 %s1316_s2, 4  ;;  %s1021_s23 = int_to_ptr.vmem [resolvable:$true] %s1020_s23 }
  0x39   :  { %1130 = vmatpush3.bf16.msra.mxu0 %v1172_v0  ;;  %1145 = vmatprep.mubr.bf16.mxu0 %v1180_v4  ;;  %v1383_v5 = vld [vmem:[#allocation8 + $0x4] ss:$8 sps:$4 sm:$0xff]   ;;  %v1385_v6 = vld [vmem:[#allocation8] ss:$8 sps:$4 sm:$0xff]   ;;  %v1388_v8 = vld [vmem:[#allocation8 + $0x14] ss:$8 sps:$4 sm:$0xff]   ;;  %p1283_p11 = scmp.lt.s32.totalorder %s1021_s23, %s1021_s23 }
  0x3a   :  { %1131 = vmatprep.subr.bf16.mxu0 %v1173_v1  ;;  %v1176_v7 = vld [vmem:[#allocation6 + $0x20] sm:$0xff]   ;;  %411 = vmatprep.subr.bf16.mxu1 %v1383_v5  ;;  %v1391_v9 = vld [vmem:[#allocation8 + $0x10] ss:$8 sps:$4 sm:$0xff]   ;;  %v1177_v11 = vld [vmem:[#allocation6 + $0x28] sm:$0xff]   ;;  %s1278_s24 = scalar_lea.vmem %s1021_s23, 256 }
  0x3b   :  { %412 = vmatpush1.bf16.msra.mxu1 %v1385_v6  ;;  %v1394_v10 = vld [vmem:[#allocation8 + $0x24] ss:$8 sps:$4 sm:$0xff]   ;;  %v1397_v12 = vld [vmem:[#allocation8 + $0x20] ss:$8 sps:$4 sm:$0xff]   ;;  %v1178_v13 = vld [vmem:[#allocation6 + $0x30] sm:$0xff]   ;;  %p1279_p10 = scmp.ne.s32.totalorder %s1021_s23, %s1278_s24  ;;  %p1284_p12 = scmp.lt.s32.totalorder %s1278_s24, %s1278_s24 }
  0x3c   :  { %413 = vmatprep.subr.bf16.mxu1 %v1388_v8  ;;  %v1400_v14 = vld [vmem:[#allocation8 + $0x34] ss:$8 sps:$4 sm:$0xff]   ;;  %v1402_v15 = vld [vmem:[#allocation8 + $0x30] ss:$8 sps:$4 sm:$0xff]   ;;  %v1404_v16 = vld [vmem:[#allocation8 + $0x44] ss:$8 sps:$4 sm:$0xff]  }
  0x3d   :  { %1132 = vmatpush3.bf16.msra.mxu0 %v1173_v1  ;;  %v1179_v17 = vld [vmem:[#allocation6 + $0x38] sm:$0xff]   ;;  %v1409_v18 = vld [vmem:[#allocation8 + $0x40] ss:$8 sps:$4 sm:$0xff]   ;;  %v1418_v22 = vld [vmem:[#allocation8 + $0x64] ss:$8 sps:$4 sm:$0xff]   ;;  %p1285_p13 = por %p1284_p12, %p1283_p11 }
  0x3e   :  { %1133 = vmatprep.subr.bf16.mxu0 %v1174_v2  ;;  %v1412_v19 = vld [vmem:[#allocation8 + $0x54] ss:$8 sps:$4 sm:$0xff]   ;;  %v1415_v20 = vld [vmem:[#allocation8 + $0x50] ss:$8 sps:$4 sm:$0xff]   ;;  %v1181_v21 = vld [vmem:[#allocation3 + $0x8] sm:$0xff]  }
  0x3f   :  { %414 = vmatpush1.bf16.msra.mxu1 %v1391_v9  ;;  %v1422_v23 = vld [vmem:[#allocation8 + $0x60] ss:$8 sps:$4 sm:$0xff]   ;;  %v1439_v24 = vld [vmem:[#allocation8 + $0x74] ss:$8 sps:$4 sm:$0xff]   ;;  %v1441_v25 = vld [vmem:[#allocation8 + $0x70] ss:$8 sps:$4 sm:$0xff]   ;;  %p1286_p0 = pnand %p1285_p13, %p1279_p10 }
  0x40   :  { %415 = vmatprep.subr.bf16.mxu1 %v1394_v10  ;;  %v1206_v27 = vld [vmem:[#allocation3 + $0x10] sm:$0xff]   ;;  %v1207_v28 = vld [vmem:[#allocation3 + $0x18] sm:$0xff]   ;;  %v1208_v29 = vld [vmem:[#allocation3 + $0x20] sm:$0xff]  }
  0x41   :  { %1134 = vmatpush3.bf16.msra.mxu0 %v1174_v2  ;;  %v1209_v30 = vld [vmem:[#allocation3 + $0x28] sm:$0xff]   ;;  %v1210_v31 = vld [vmem:[#allocation3 + $0x30] sm:$0xff]   ;;  %v1211_v32 = vld [vmem:[#allocation3 + $0x38] sm:$0xff]  }
  0x42   :  { %1135 = vmatprep.subr.bf16.mxu0 %v1175_v3 }
  0x43   :  { %416 = vmatpush1.bf16.msra.mxu1 %v1397_v12 }
  0x44   :  { %417 = vmatprep.subr.bf16.mxu1 %v1400_v14 }
  0x45   :  { %1136 = vmatpush3.bf16.msra.mxu0 %v1175_v3 }
  0x46   :  { %1137 = vmatprep.subr.bf16.mxu0 %v1176_v7 }
  0x47   :  { %418 = vmatpush1.bf16.msra.mxu1 %v1402_v15 }
  0x48   :  { %419 = vmatprep.subr.bf16.mxu1 %v1404_v16 }
  0x49   :  { %1138 = vmatpush3.bf16.msra.mxu0 %v1176_v7 }
  0x4a   :  { %1139 = vmatprep.subr.bf16.mxu0 %v1177_v11 }
  0x4b   :  { %420 = vmatpush1.bf16.msra.mxu1 %v1409_v18 }
  0x4c   :  { %421 = vmatprep.subr.bf16.mxu1 %v1412_v19 }
  0x4d   :  { %1140 = vmatpush3.bf16.msra.mxu0 %v1177_v11 }
  0x4e   :  { %1141 = vmatprep.subr.bf16.mxu0 %v1178_v13 }
  0x4f   :  { %422 = vmatpush1.bf16.msra.mxu1 %v1415_v20 }
  0x50   :  { %423 = vmatprep.subr.bf16.mxu1 %v1418_v22 }
  0x51   :  { %1142 = vmatpush3.bf16.msra.mxu0 %v1178_v13 }
  0x52   :  { %1143 = vmatprep.subr.bf16.mxu0 %v1179_v17 }
  0x53   :  { %424 = vmatpush1.bf16.msra.mxu1 %v1422_v23 }
  0x54   :  { %425 = vmatprep.subr.bf16.mxu1 %v1439_v24 }
  0x55   :  { %1144 = vmatpush3.bf16.msra.mxu0 %v1179_v17 }
  0x56   :  { %488 = vmatprep.subr.bf16.mxu0 %v1383_v5 }
  0x57   :  { %426 = vmatpush1.bf16.msra.mxu1 %v1441_v25 }
  0x58   :  { %1146 = vmatmul.mubr.bf16.vlgmr.msra.gmra.mrb[0].mxu0 %v1181_v21  ;;  %567 = vmatprep.subr.bf16.mxu1 %v1383_v5 }
  0x59   :  { %489 = vmatpush1.bf16.msra.mxu0 %v1385_v6  ;;  %1149 = vmatprep.mubr.bf16.mxu0 %v1206_v27 }
  0x5a   :  { %490 = vmatprep.subr.bf16.mxu0 %v1388_v8 }
  0x5d   :  { %491 = vmatpush1.bf16.msra.mxu0 %v1391_v9 }
  0x5e   :  { %492 = vmatprep.subr.bf16.mxu0 %v1394_v10 }
  0x60   :  { %1150 = vmatmul.mubr.bf16.gmra.mrb[4].mxu0 %v1207_v28 }
  0x61   :  { %493 = vmatpush1.bf16.msra.mxu0 %v1397_v12  ;;  %1153 = vmatprep.mubr.bf16.mxu0 %v1208_v29 }
  0x62   :  { %494 = vmatprep.subr.bf16.mxu0 %v1400_v14 }
  0x65   :  { %495 = vmatpush1.bf16.msra.mxu0 %v1402_v15 }
  0x66   :  { %496 = vmatprep.subr.bf16.mxu0 %v1404_v16 }
  0x68   :  { %1154 = vmatmul.mubr.bf16.gmra.mrb[8].mxu0 %v1209_v30 }
  0x69   :  { %497 = vmatpush1.bf16.msra.mxu0 %v1409_v18  ;;  %1157 = vmatprep.mubr.bf16.mxu0 %v1210_v31 }
  0x6a   :  { %498 = vmatprep.subr.bf16.mxu0 %v1412_v19 }
  0x6d   :  { %499 = vmatpush1.bf16.msra.mxu0 %v1415_v20 }
  0x6e   :  { %500 = vmatprep.subr.bf16.mxu0 %v1418_v22 }
  0x70   :  { %1158 = vmatmul.mubr.bf16.gmra.mrb[12].mxu0 %v1211_v32  ;;  %v1315_v32 = vmov 0.0  }
  0x71   :  { %501 = vmatpush1.bf16.msra.mxu0 %v1422_v23  ;;  %520 = vmatprep.mubr.bf16.mxu0 %v1313_v26 }
  0x72   :  { %502 = vmatprep.subr.bf16.mxu0 %v1439_v24 }
  0x75   :  { %503 = vmatpush1.bf16.msra.mxu0 %v1441_v25 }
  0x76   :  { %646 = vmatprep.subr.bf16.mxu0 %v1383_v5 }
 0x12b   :  { %v1147_v33 = vpop.f32.mrb[0].mxu0 }
 0x12c   :  { %v219_v34 = vpop.f32.mrb[1].mxu0 }
 0x12d   :  { %v1148_v35 = vpop.f32.mrb[2].mxu0  ;;  %vm304_vm0 = vcmp.gt.f32.partialorder %v219_v34, 0.3  ;;  %vm311_vm3 = vcmp.lt.f32.partialorder %v219_v34, 0.3 }
 0x12e   :  { %v222_v36 = vpop.f32.mrb[3].mxu0  ;;  %v313_v50 = vsel %vm311_vm3, %v219_v34, 0.0 }
 0x12f   :  { %vm305_vm1 = vcmp.gt.f32.partialorder %v222_v36, 0.3  ;;  %vm312_vm4 = vcmp.lt.f32.partialorder %v222_v36, 0.3  ;;  %v473_v53 = vmul.f32 0.29974616, %v313_v50 }
 0x130   :  { %vm1067_vm2 = vmpackc.low %vm305_vm1, %vm304_vm0  ;;  %v314_v51 = vsel %vm312_vm4, %v222_v36, 0.0 }
 0x131   :  { %1068 = vmatmul.mubr.msk.bf16.vlgmr.msra.gmra.mrb[0].mxu1 %vm1067_vm2, %v1314_v37  ;;  %v474_v57 = vmul.f32 0.29974616, %v314_v51 }
 0x132   :  { %568 = vmatpush1.bf16.msra.mxu1 %v1385_v6  ;;  %599 = vmatprep.mubr.bf16.mxu1 %v1313_v26 }
 0x133   :  { %569 = vmatprep.subr.bf16.mxu1 %v1388_v8  ;;  %v1469_v38 = vpop.f32.mrb[4].mxu0 }
 0x134   :  { %v235_v39 = vpop.f32.mrb[5].mxu0 }
 0x135   :  { %v1471_v40 = vpop.f32.mrb[6].mxu0 }
 0x136   :  { %570 = vmatpush1.bf16.msra.mxu1 %v1391_v9  ;;  %v238_v41 = vpop.f32.mrb[7].mxu0 }
 0x137   :  { %571 = vmatprep.subr.bf16.mxu1 %v1394_v10 }
 0x13a   :  { %572 = vmatpush1.bf16.msra.mxu1 %v1397_v12 }
 0x13b   :  { %573 = vmatprep.subr.bf16.mxu1 %v1400_v14  ;;  %v1473_v42 = vpop.f32.mrb[8].mxu0 }
 0x13c   :  { %v1475_v43 = vpop.f32.mrb[9].mxu0 }
 0x13d   :  { %v1477_v44 = vpop.f32.mrb[10].mxu0 }
 0x13e   :  { %574 = vmatpush1.bf16.msra.mxu1 %v1402_v15  ;;  %v1479_v45 = vpop.f32.mrb[11].mxu0 }
 0x13f   :  { %575 = vmatprep.subr.bf16.mxu1 %v1404_v16 }
 0x142   :  { %576 = vmatpush1.bf16.msra.mxu1 %v1409_v18 }
 0x143   :  { %577 = vmatprep.subr.bf16.mxu1 %v1412_v19  ;;  %v1481_v46 = vpop.f32.mrb[12].mxu0 }
 0x144   :  { %v1483_v47 = vpop.f32.mrb[13].mxu0 }
 0x145   :  { %v1485_v48 = vpop.f32.mrb[14].mxu0 }
 0x146   :  { %578 = vmatpush1.bf16.msra.mxu1 %v1415_v20  ;;  %v1487_v49 = vpop.f32.mrb[15].mxu0 }
 0x147   :  { %579 = vmatprep.subr.bf16.mxu1 %v1418_v22 }
 0x14a   :  { %580 = vmatpush1.bf16.msra.mxu1 %v1422_v23 }
 0x14b   :  { %581 = vmatprep.subr.bf16.mxu1 %v1439_v24 }
 0x14e   :  { %582 = vmatpush1.bf16.msra.mxu1 %v1441_v25 }
 0x14f   :  { %725 = vmatprep.subr.bf16.mxu1 %v1383_v5 }
 0x204   :  { %v445_v52 = vpop.f32.mrb[0].mxu1 }
 0x205   :  { %v471_v54 = vadd.f32 %v1147_v33, %v445_v52  ;;  %v447_v55 = vpop.f32.mrb[1].mxu1 }
 0x206   :  { %v449_v56 = vpop.f32.mrb[2].mxu1  ;;  %vm462_vm8 = vcmp.lt.f32.partialorder %v447_v55, 0.3  ;;  %vm456_vm12 = vcmp.gt.f32.partialorder %v447_v55, 0.3 }
 0x207   :  { %v475_v58 = vadd.f32 %v473_v53, %v471_v54  ;;  %v472_v59 = vadd.f32 %v1148_v35, %v449_v56  ;;  %v451_v60 = vpop.f32.mrb[3].mxu1  ;;  %v464_v62 = vsel %vm462_vm8, %v447_v55, 0.0  ;;  %v1069_v33 = vsel %vm456_vm12, 1.0, %v1315_v32 }
 0x208   :  { %vm463_vm10 = vcmp.lt.f32.partialorder %v451_v60, 0.3  ;;  %v531_v2 = vmul.f32 0.29974616, %v464_v62  ;;  %vm457_vm13 = vcmp.gt.f32.partialorder %v451_v60, 0.3 }
 0x209   :  { %v476_v61 = vadd.f32 %v474_v57, %v472_v59  ;;  %vm477_vm5 = vcmp.gt.f32.partialorder %v475_v58, 0.3  ;;  %vm484_vm9 = vcmp.lt.f32.partialorder %v475_v58, 0.3  ;;  %v465_v0 = vsel %vm463_vm10, %v451_v60, 0.0 }
 0x20a   :  { %v486_v63 = vsel %vm484_vm9, %v475_v58, 0.0  ;;  %v532_v21 = vmul.f32 0.29974616, %v465_v0 }
 0x20b   :  { %vm478_vm6 = vcmp.gt.f32.partialorder %v476_v61, 0.3  ;;  %vm485_vm11 = vcmp.lt.f32.partialorder %v476_v61, 0.3  ;;  %v552_v7 = vmul.f32 0.29974616, %v486_v63 }
 0x20c   :  { %vm1073_vm7 = vmpackc.low %vm478_vm6, %vm477_vm5  ;;  %v487_v3 = vsel %vm485_vm11, %v476_v61, 0.0 }
 0x20d   :  { %1074 = vmatmul.mubr.msk.bf16.vlgmr.msra.gmra.mrb[16].mxu0 %vm1073_vm7, %v1314_v37  ;;  %v553_v29 = vmul.f32 0.29974616, %v487_v3 }
 0x20e   :  { %647 = vmatpush1.bf16.msra.mxu0 %v1385_v6  ;;  %678 = vmatprep.mubr.bf16.mxu0 %v1313_v26 }
 0x20f   :  { %648 = vmatprep.subr.bf16.mxu0 %v1388_v8 }
 0x212   :  { %649 = vmatpush1.bf16.msra.mxu0 %v1391_v9 }
 0x213   :  { %650 = vmatprep.subr.bf16.mxu0 %v1394_v10 }
 0x216   :  { %651 = vmatpush1.bf16.msra.mxu0 %v1397_v12 }
 0x217   :  { %652 = vmatprep.subr.bf16.mxu0 %v1400_v14 }
 0x21a   :  { %653 = vmatpush1.bf16.msra.mxu0 %v1402_v15 }
 0x21b   :  { %654 = vmatprep.subr.bf16.mxu0 %v1404_v16 }
 0x21e   :  { %655 = vmatpush1.bf16.msra.mxu0 %v1409_v18 }
 0x21f   :  { %656 = vmatprep.subr.bf16.mxu0 %v1412_v19 }
 0x222   :  { %657 = vmatpush1.bf16.msra.mxu0 %v1415_v20 }
 0x223   :  { %658 = vmatprep.subr.bf16.mxu0 %v1418_v22 }
 0x226   :  { %659 = vmatpush1.bf16.msra.mxu0 %v1422_v23 }
 0x227   :  { %660 = vmatprep.subr.bf16.mxu0 %v1439_v24 }
 0x22a   :  { %661 = vmatpush1.bf16.msra.mxu0 %v1441_v25 }
 0x22b   :  { %804 = vmatprep.subr.bf16.mxu0 %v1383_v5 }
 0x2e0   :  { %v522_v1 = vpop.f32.mrb[16].mxu0 }
 0x2e1   :  { %v550_v4 = vadd.f32 %v522_v1, %v235_v39  ;;  %v524_v11 = vpop.f32.mrb[17].mxu0  ;;  %v1070_v39 = vsel %vm457_vm13, 1.0, %v1315_v32 }
 0x2e2   :  { %v533_v13 = vadd.f32 %v531_v2, %v524_v11  ;;  %v526_v17 = vpop.f32.mrb[18].mxu0 }
 0x2e3   :  { %v554_v27 = vadd.f32 %v552_v7, %v550_v4  ;;  %v551_v28 = vadd.f32 %v526_v17, %v238_v41  ;;  %v528_v30 = vpop.f32.mrb[19].mxu0 }
 0x2e4   :  { %vm535_vm14 = vcmp.gt.f32.partialorder %v533_v13, 0.3  ;;  %v534_v31 = vadd.f32 %v532_v21, %v528_v30  ;;  %vm541_vm3 = vcmp.lt.f32.partialorder %v533_v13, 0.3 }
 0x2e5   :  { %v1075_v34 = vsel %vm535_vm14, 1.0, %v1315_v32  ;;  %v555_v35 = vadd.f32 %v553_v29, %v551_v28  ;;  %vm556_vm0 = vcmp.gt.f32.partialorder %v554_v27, 0.3  ;;  %vm563_vm4 = vcmp.lt.f32.partialorder %v554_v27, 0.3 }
 0x2e6   :  { %v545_v36 = vadd.f32 %v1075_v34, %v1069_v33  ;;  %vm536_vm15 = vcmp.gt.f32.partialorder %v534_v31, 0.3  ;;  %vm542_vm5 = vcmp.lt.f32.partialorder %v534_v31, 0.3  ;;  %v543_v51 = vsel %vm541_vm3, %v533_v13, 0.0 }
 0x2e7   :  { %v1076_v50 = vsel %vm536_vm15, 1.0, %v1315_v32  ;;  %vm557_vm1 = vcmp.gt.f32.partialorder %v555_v35, 0.3  ;;  %vm564_vm6 = vcmp.lt.f32.partialorder %v555_v35, 0.3  ;;  %v565_v52 = vsel %vm563_vm4, %v554_v27, 0.0 }
 0x2e8   :  { %v546_v41 = vadd.f32 %v1076_v50, %v1070_v39  ;;  %vm1079_vm2 = vmpackc.low %vm557_vm1, %vm556_vm0  ;;  %v544_v53 = vsel %vm542_vm5, %v534_v31, 0.0  ;;  %v610_v55 = vmul.f32 0.29974616, %v543_v51  ;;  %v566_v56 = vsel %vm564_vm6, %v555_v35, 0.0 }
 0x2e9   :  { %1080 = vmatmul.mubr.msk.bf16.vlgmr.msra.gmra.mrb[4].mxu1 %vm1079_vm2, %v1314_v37  ;;  %v631_v58 = vmul.f32 0.29974616, %v565_v52  ;;  %v611_v62 = vmul.f32 0.29974616, %v544_v53  ;;  %v632_v1 = vmul.f32 0.29974616, %v566_v56 }
 0x2ea   :  { %726 = vmatpush1.bf16.msra.mxu1 %v1385_v6  ;;  %757 = vmatprep.mubr.bf16.mxu1 %v1313_v26 }
 0x2eb   :  { %727 = vmatprep.subr.bf16.mxu1 %v1388_v8 }
 0x2ee   :  { %728 = vmatpush1.bf16.msra.mxu1 %v1391_v9 }
 0x2ef   :  { %729 = vmatprep.subr.bf16.mxu1 %v1394_v10 }
 0x2f2   :  { %730 = vmatpush1.bf16.msra.mxu1 %v1397_v12 }
 0x2f3   :  { %731 = vmatprep.subr.bf16.mxu1 %v1400_v14 }
 0x2f6   :  { %732 = vmatpush1.bf16.msra.mxu1 %v1402_v15 }
 0x2f7   :  { %733 = vmatprep.subr.bf16.mxu1 %v1404_v16 }
 0x2fa   :  { %734 = vmatpush1.bf16.msra.mxu1 %v1409_v18 }
 0x2fb   :  { %735 = vmatprep.subr.bf16.mxu1 %v1412_v19 }
 0x2fe   :  { %736 = vmatpush1.bf16.msra.mxu1 %v1415_v20 }
 0x2ff   :  { %737 = vmatprep.subr.bf16.mxu1 %v1418_v22 }
 0x302   :  { %738 = vmatpush1.bf16.msra.mxu1 %v1422_v23 }
 0x303   :  { %739 = vmatprep.subr.bf16.mxu1 %v1439_v24 }
 0x306   :  { %740 = vmatpush1.bf16.msra.mxu1 %v1441_v25 }
 0x307   :  { %883 = vmatprep.subr.bf16.mxu1 %v1383_v5 }
 0x3bc   :  { %v601_v54 = vpop.f32.mrb[4].mxu1 }
 0x3bd   :  { %v629_v57 = vadd.f32 %v1469_v38, %v601_v54  ;;  %v603_v59 = vpop.f32.mrb[5].mxu1 }
 0x3be   :  { %v612_v60 = vadd.f32 %v610_v55, %v603_v59  ;;  %v605_v61 = vpop.f32.mrb[6].mxu1 }
 0x3bf   :  { %v633_v63 = vadd.f32 %v631_v58, %v629_v57  ;;  %v630_v0 = vadd.f32 %v1471_v40, %v605_v61  ;;  %v607_v2 = vpop.f32.mrb[7].mxu1 }
 0x3c0   :  { %vm614_vm7 = vcmp.gt.f32.partialorder %v612_v60, 0.3  ;;  %v613_v3 = vadd.f32 %v611_v62, %v607_v2  ;;  %vm620_vm12 = vcmp.lt.f32.partialorder %v612_v60, 0.3 }
 0x3c1   :  { %v1081_v4 = vsel %vm614_vm7, 1.0, %v1315_v32  ;;  %v634_v7 = vadd.f32 %v632_v1, %v630_v0  ;;  %vm635_vm9 = vcmp.gt.f32.partialorder %v633_v63, 0.3  ;;  %vm642_vm13 = vcmp.lt.f32.partialorder %v633_v63, 0.3 }
 0x3c2   :  { %v624_v11 = vadd.f32 %v1081_v4, %v545_v36  ;;  %vm615_vm8 = vcmp.gt.f32.partialorder %v613_v3, 0.3  ;;  %vm621_vm14 = vcmp.lt.f32.partialorder %v613_v3, 0.3  ;;  %v622_v40 = vsel %vm620_vm12, %v612_v60, 0.0 }
 0x3c3   :  { %v1082_v13 = vsel %vm615_vm8, 1.0, %v1315_v32  ;;  %vm636_vm10 = vcmp.gt.f32.partialorder %v634_v7, 0.3  ;;  %vm643_vm15 = vcmp.lt.f32.partialorder %v634_v7, 0.3  ;;  %v644_v17 = vsel %vm642_vm13, %v633_v63, 0.0 }
 0x3c4   :  { %v625_v38 = vadd.f32 %v1082_v13, %v546_v41  ;;  %vm1085_vm11 = vmpackc.low %vm636_vm10, %vm635_vm9  ;;  %v623_v21 = vsel %vm621_vm14, %v613_v3, 0.0  ;;  %v689_v28 = vmul.f32 0.29974616, %v622_v40  ;;  %v645_v29 = vsel %vm643_vm15, %v634_v7, 0.0 }
 0x3c5   :  { %1086 = vmatmul.mubr.msk.bf16.vlgmr.msra.gmra.mrb[20].mxu0 %vm1085_vm11, %v1314_v37  ;;  %v710_v31 = vmul.f32 0.29974616, %v644_v17  ;;  %v690_v36 = vmul.f32 0.29974616, %v623_v21  ;;  %v711_v50 = vmul.f32 0.29974616, %v645_v29 }
 0x3c6   :  { %805 = vmatpush1.bf16.msra.mxu0 %v1385_v6  ;;  %836 = vmatprep.mubr.bf16.mxu0 %v1313_v26 }
 0x3c7   :  { %806 = vmatprep.subr.bf16.mxu0 %v1388_v8 }
 0x3ca   :  { %807 = vmatpush1.bf16.msra.mxu0 %v1391_v9 }
 0x3cb   :  { %808 = vmatprep.subr.bf16.mxu0 %v1394_v10 }
 0x3ce   :  { %809 = vmatpush1.bf16.msra.mxu0 %v1397_v12 }
 0x3cf   :  { %810 = vmatprep.subr.bf16.mxu0 %v1400_v14 }
 0x3d2   :  { %811 = vmatpush1.bf16.msra.mxu0 %v1402_v15 }
 0x3d3   :  { %812 = vmatprep.subr.bf16.mxu0 %v1404_v16 }
 0x3d6   :  { %813 = vmatpush1.bf16.msra.mxu0 %v1409_v18 }
 0x3d7   :  { %814 = vmatprep.subr.bf16.mxu0 %v1412_v19 }
 0x3da   :  { %815 = vmatpush1.bf16.msra.mxu0 %v1415_v20 }
 0x3db   :  { %816 = vmatprep.subr.bf16.mxu0 %v1418_v22 }
 0x3de   :  { %817 = vmatpush1.bf16.msra.mxu0 %v1422_v23 }
 0x3df   :  { %818 = vmatprep.subr.bf16.mxu0 %v1439_v24 }
 0x3e2   :  { %819 = vmatpush1.bf16.msra.mxu0 %v1441_v25 }
 0x3e3   :  { %958 = vmatprep.subr.bf16.mxu0 %v1383_v5 }
 0x498   :  { %v680_v27 = vpop.f32.mrb[20].mxu0 }
 0x499   :  { %v708_v30 = vadd.f32 %v680_v27, %v1475_v43  ;;  %v682_v33 = vpop.f32.mrb[21].mxu0 }
 0x49a   :  { %v691_v34 = vadd.f32 %v689_v28, %v682_v33  ;;  %v684_v35 = vpop.f32.mrb[22].mxu0 }
 0x49b   :  { %v712_v39 = vadd.f32 %v710_v31, %v708_v30  ;;  %v709_v5 = vadd.f32 %v684_v35, %v1479_v45  ;;  %v686_v41 = vpop.f32.mrb[23].mxu0 }
 0x49c   :  { %vm693_vm0 = vcmp.gt.f32.partialorder %v691_v34, 0.3  ;;  %v692_v51 = vadd.f32 %v690_v36, %v686_v41  ;;  %vm699_vm5 = vcmp.lt.f32.partialorder %v691_v34, 0.3 }
 0x49d   :  { %v1087_v52 = vsel %vm693_vm0, 1.0, %v1315_v32  ;;  %v713_v53 = vadd.f32 %v711_v50, %v709_v5  ;;  %vm714_vm2 = vcmp.gt.f32.partialorder %v712_v39, 0.3  ;;  %vm721_vm6 = vcmp.lt.f32.partialorder %v712_v39, 0.3 }
 0x49e   :  { %v703_v54 = vadd.f32 %v1087_v52, %v624_v11  ;;  %vm694_vm1 = vcmp.gt.f32.partialorder %v692_v51, 0.3  ;;  %vm700_vm7 = vcmp.lt.f32.partialorder %v692_v51, 0.3  ;;  %v701_v45 = vsel %vm699_vm5, %v691_v34, 0.0 }
 0x49f   :  { %v1088_v55 = vsel %vm694_vm1, 1.0, %v1315_v32  ;;  %vm715_vm3 = vcmp.gt.f32.partialorder %v713_v53, 0.3  ;;  %vm722_vm8 = vcmp.lt.f32.partialorder %v713_v53, 0.3  ;;  %v723_v56 = vsel %vm721_vm6, %v712_v39, 0.0 }
 0x4a0   :  { %v704_v43 = vadd.f32 %v1088_v55, %v625_v38  ;;  %vm1091_vm4 = vmpackc.low %vm715_vm3, %vm714_vm2  ;;  %v702_v57 = vsel %vm700_vm7, %v692_v51, 0.0  ;;  %v768_v59 = vmul.f32 0.29974616, %v701_v45  ;;  %v724_v60 = vsel %vm722_vm8, %v713_v53, 0.0 }
 0x4a1   :  { %1092 = vmatmul.mubr.msk.bf16.vlgmr.msra.gmra.mrb[8].mxu1 %vm1091_vm4, %v1314_v37  ;;  %v789_v62 = vmul.f32 0.29974616, %v723_v56  ;;  %v769_v2 = vmul.f32 0.29974616, %v702_v57  ;;  %v790_v7 = vmul.f32 0.29974616, %v724_v60 }
 0x4a2   :  { %884 = vmatpush1.bf16.msra.mxu1 %v1385_v6  ;;  %915 = vmatprep.mubr.bf16.mxu1 %v1313_v26 }
 0x4a3   :  { %885 = vmatprep.subr.bf16.mxu1 %v1388_v8 }
 0x4a6   :  { %886 = vmatpush1.bf16.msra.mxu1 %v1391_v9 }
 0x4a7   :  { %887 = vmatprep.subr.bf16.mxu1 %v1394_v10 }
 0x4aa   :  { %888 = vmatpush1.bf16.msra.mxu1 %v1397_v12 }
 0x4ab   :  { %889 = vmatprep.subr.bf16.mxu1 %v1400_v14 }
 0x4ae   :  { %890 = vmatpush1.bf16.msra.mxu1 %v1402_v15 }
 0x4af   :  { %891 = vmatprep.subr.bf16.mxu1 %v1404_v16 }
 0x4b2   :  { %892 = vmatpush1.bf16.msra.mxu1 %v1409_v18 }
 0x4b3   :  { %893 = vmatprep.subr.bf16.mxu1 %v1412_v19 }
 0x4b6   :  { %894 = vmatpush1.bf16.msra.mxu1 %v1415_v20 }
 0x4b7   :  { %895 = vmatprep.subr.bf16.mxu1 %v1418_v22 }
 0x4ba   :  { %896 = vmatpush1.bf16.msra.mxu1 %v1422_v23 }
 0x4bb   :  { %897 = vmatprep.subr.bf16.mxu1 %v1439_v24 }
 0x4be   :  { %898 = vmatpush1.bf16.msra.mxu1 %v1441_v25 }
 0x574   :  { %v759_v58 = vpop.f32.mrb[8].mxu1 }
 0x575   :  { %v787_v61 = vadd.f32 %v1473_v42, %v759_v58  ;;  %v761_v63 = vpop.f32.mrb[9].mxu1 }
 0x576   :  { %v770_v0 = vadd.f32 %v768_v59, %v761_v63  ;;  %v763_v1 = vpop.f32.mrb[10].mxu1 }
 0x577   :  { %v791_v3 = vadd.f32 %v789_v62, %v787_v61  ;;  %v788_v4 = vadd.f32 %v1477_v44, %v763_v1  ;;  %v765_v11 = vpop.f32.mrb[11].mxu1 }
 0x578   :  { %vm772_vm9 = vcmp.gt.f32.partialorder %v770_v0, 0.3  ;;  %v771_v13 = vadd.f32 %v769_v2, %v765_v11  ;;  %vm778_vm14 = vcmp.lt.f32.partialorder %v770_v0, 0.3 }
 0x579   :  { %v1093_v38 = vsel %vm772_vm9, 1.0, %v1315_v32  ;;  %v792_v40 = vadd.f32 %v790_v7, %v788_v4  ;;  %vm793_vm11 = vcmp.gt.f32.partialorder %v791_v3, 0.3  ;;  %vm800_vm15 = vcmp.lt.f32.partialorder %v791_v3, 0.3 }
 0x57a   :  { %v782_v17 = vadd.f32 %v1093_v38, %v703_v54  ;;  %vm773_vm10 = vcmp.gt.f32.partialorder %v771_v13, 0.3  ;;  %vm779_vm0 = vcmp.lt.f32.partialorder %v771_v13, 0.3 }
 0x57b   :  { %v1094_v21 = vsel %vm773_vm10, 1.0, %v1315_v32  ;;  %vm794_vm12 = vcmp.gt.f32.partialorder %v792_v40, 0.3  ;;  %vm801_vm1 = vcmp.lt.f32.partialorder %v792_v40, 0.3 }
 0x57c   :  { %v783_v42 = vadd.f32 %v1094_v21, %v704_v43  ;;  %vm1097_vm13 = vmpackc.low %vm794_vm12, %vm793_vm11 }
 0x57d   :  { %1098 = vmatmul.mubr.msk.bf16.vlgmr.msra.gmra.mrb[24].mxu0 %vm1097_vm13, %v1314_v37 }
 0x57e   :  { %959 = vmatpush1.bf16.msra.mxu0 %v1385_v6  ;;  %990 = vmatprep.mubr.bf16.mxu0 %v1313_v26  ;;  %v780_v6 = vsel %vm778_vm14, %v770_v0, 0.0 }
 0x57f   :  { %960 = vmatprep.subr.bf16.mxu0 %v1388_v8  ;;  %v802_v8 = vsel %vm800_vm15, %v791_v3, 0.0 }
 0x582   :  { %961 = vmatpush1.bf16.msra.mxu0 %v1391_v9  ;;  %v781_v9 = vsel %vm779_vm0, %v771_v13, 0.0 }
 0x583   :  { %962 = vmatprep.subr.bf16.mxu0 %v1394_v10 }
 0x586   :  { %963 = vmatpush1.bf16.msra.mxu0 %v1397_v12  ;;  %v847_v12 = vmul.f32 0.29974616, %v780_v6 }
 0x587   :  { %964 = vmatprep.subr.bf16.mxu0 %v1400_v14  ;;  %v803_v14 = vsel %vm801_vm1, %v792_v40, 0.0 }
 0x58a   :  { %965 = vmatpush1.bf16.msra.mxu0 %v1402_v15 }
 0x58b   :  { %966 = vmatprep.subr.bf16.mxu0 %v1404_v16  ;;  %v868_v16 = vmul.f32 0.29974616, %v802_v8 }
 0x58e   :  { %967 = vmatpush1.bf16.msra.mxu0 %v1409_v18 }
 0x58f   :  { %968 = vmatprep.subr.bf16.mxu0 %v1412_v19 }
 0x592   :  { %969 = vmatpush1.bf16.msra.mxu0 %v1415_v20 }
 0x593   :  { %970 = vmatprep.subr.bf16.mxu0 %v1418_v22  ;;  %v848_v22 = vmul.f32 0.29974616, %v781_v9 }
 0x596   :  { %971 = vmatpush1.bf16.msra.mxu0 %v1422_v23 }
 0x597   :  { %972 = vmatprep.subr.bf16.mxu0 %v1439_v24 }
 0x59a   :  { %973 = vmatpush1.bf16.msra.mxu0 %v1441_v25  ;;  %v869_v25 = vmul.f32 0.29974616, %v803_v14 }
 0x650   :  { %v838_v10 = vpop.f32.mrb[24].mxu0 }
 0x651   :  { %v866_v15 = vadd.f32 %v838_v10, %v1483_v47  ;;  %v840_v18 = vpop.f32.mrb[25].mxu0 }
 0x652   :  { %v849_v19 = vadd.f32 %v847_v12, %v840_v18  ;;  %v842_v20 = vpop.f32.mrb[26].mxu0 }
 0x653   :  { %v870_v23 = vadd.f32 %v868_v16, %v866_v15  ;;  %v867_v24 = vadd.f32 %v842_v20, %v1487_v49  ;;  %v844_v26 = vpop.f32.mrb[27].mxu0 }
 0x654   :  { %vm851_vm2 = vcmp.gt.f32.partialorder %v849_v19, 0.3  ;;  %v850_v44 = vadd.f32 %v848_v22, %v844_v26  ;;  %vm857_vm7 = vcmp.lt.f32.partialorder %v849_v19, 0.3 }
 0x655   :  { %v1099_v27 = vsel %vm851_vm2, 1.0, %v1315_v32  ;;  %v871_v28 = vadd.f32 %v869_v25, %v867_v24  ;;  %vm872_vm4 = vcmp.gt.f32.partialorder %v870_v23, 0.3  ;;  %vm879_vm8 = vcmp.lt.f32.partialorder %v870_v23, 0.3 }
 0x656   :  { %vm852_vm3 = vcmp.gt.f32.partialorder %v850_v44, 0.3  ;;  %v861_v47 = vadd.f32 %v1099_v27, %v782_v17  ;;  %vm858_vm9 = vcmp.lt.f32.partialorder %v850_v44, 0.3  ;;  %v859_v49 = vsel %vm857_vm7, %v849_v19, 0.0 }
 0x657   :  { %v1100_v29 = vsel %vm852_vm3, 1.0, %v1315_v32  ;;  %vm873_vm5 = vcmp.gt.f32.partialorder %v871_v28, 0.3  ;;  %vm880_vm10 = vcmp.lt.f32.partialorder %v871_v28, 0.3  ;;  %v881_v31 = vsel %vm879_vm8, %v870_v23, 0.0 }
 0x658   :  { %vm1103_vm6 = vmpackc.low %vm873_vm5, %vm872_vm4  ;;  %v862_v30 = vadd.f32 %v1100_v29, %v783_v42  ;;  %v860_v33 = vsel %vm858_vm9, %v850_v44, 0.0  ;;  %v926_v35 = vmul.f32 0.29974616, %v859_v49  ;;  %v882_v36 = vsel %vm880_vm10, %v871_v28, 0.0 }
 0x659   :  { %1104 = vmatmul.mubr.msk.bf16.vlgmr.msra.gmra.mrb[12].mxu1 %vm1103_vm6, %v1314_v37  ;;  %v947_v5 = vmul.f32 0.29974616, %v881_v31  ;;  %v927_v52 = vmul.f32 0.29974616, %v860_v33  ;;  %v948_v55 = vmul.f32 0.29974616, %v882_v36 }
 0x72c   :  { %v917_v34 = vpop.f32.mrb[12].mxu1 }
 0x72d   :  { %v945_v39 = vadd.f32 %v1481_v46, %v917_v34  ;;  %v919_v50 = vpop.f32.mrb[13].mxu1 }
 0x72e   :  { %v928_v41 = vadd.f32 %v926_v35, %v919_v50  ;;  %v921_v51 = vpop.f32.mrb[14].mxu1 }
 0x72f   :  { %v949_v53 = vadd.f32 %v947_v5, %v945_v39  ;;  %v946_v54 = vadd.f32 %v1485_v48, %v921_v51  ;;  %v923_v43 = vpop.f32.mrb[15].mxu1 }
 0x730   :  { %vm930_vm11 = vcmp.gt.f32.partialorder %v928_v41, 0.3  ;;  %v929_v45 = vadd.f32 %v927_v52, %v923_v43  ;;  %vm936_vm0 = vcmp.lt.f32.partialorder %v928_v41, 0.3 }
 0x731   :  { %v950_v56 = vadd.f32 %v948_v55, %v946_v54  ;;  %v1105_v57 = vsel %vm930_vm11, 1.0, %v1315_v32  ;;  %vm951_vm13 = vcmp.gt.f32.partialorder %v949_v53, 0.3  ;;  %v938_v48 = vsel %vm936_vm0, %v928_v41, 0.0 }
 0x732   :  { %vm931_vm12 = vcmp.gt.f32.partialorder %v929_v45, 0.3  ;;  %v940_v58 = vadd.f32 %v1105_v57, %v861_v47  ;;  %vm937_vm1 = vcmp.lt.f32.partialorder %v929_v45, 0.3  ;;  %v999_v62 = vmul.f32 0.29974616, %v938_v48 }
 0x733   :  { %vm952_vm14 = vcmp.gt.f32.partialorder %v950_v56, 0.3  ;;  %v1106_v46 = vsel %vm931_vm12, 1.0, %v1315_v32  ;;  %v939_v60 = vsel %vm937_vm1, %v929_v45, 0.0 }
 0x734   :  { %vm1109_vm15 = vmpackc.low %vm952_vm14, %vm951_vm13  ;;  %v941_v59 = vadd.f32 %v1106_v46, %v862_v30  ;;  %v1000_v2 = vmul.f32 0.29974616, %v939_v60 }
 0x735   :  { %1110 = vmatmul.mubr.msk.bf16.vlgmr.msra.gmra.mrb[28].mxu0 %vm1109_vm15, %v1314_v37 }
 0x808   :  { %v992_v61 = vpop.f32.mrb[28].mxu0 }
 0x809   :  { %v993_v63 = vpop.f32.mrb[29].mxu0 }
 0x80a   :  { %v1001_v0 = vadd.f32 %v999_v62, %v993_v63  ;;  %v995_v1 = vpop.f32.mrb[30].mxu0 }
 0x80b   :  { %v996_v3 = vpop.f32.mrb[31].mxu0 }
 0x80c   :  { %vm1003_vm2 = vcmp.gt.f32.partialorder %v1001_v0, 0.3  ;;  %v1002_v4 = vadd.f32 %v1000_v2, %v996_v3 }
 0x80d   :  { %v1111_v7 = vsel %vm1003_vm2, 1.0, %v1315_v32 }
 0x80e   :  { %v1009_v11 = vadd.f32 %v1111_v7, %v940_v58  ;;  %vm1004_vm3 = vcmp.gt.f32.partialorder %v1002_v4, 0.3 }
 0x80f   :  { %v1112_v13 = vsel %vm1004_vm3, 1.0, %v1315_v32 }
 0x810   :  { %v1011_v37 = vmul.f32 0.125, %v1009_v11  ;;  %v1010_v38 = vadd.f32 %v1112_v13, %v941_v59 }
 0x812   :  { %1013 = vst [vmem:[#allocation9] sm:$0xff] %v1011_v37  ;;  %v1012_v40 = vmul.f32 0.125, %v1010_v38 }
 0x814   :  { %1014 = vst [vmem:[#allocation9 + $0x8] sm:$0xff] %v1012_v40 }
 0x815   :  { %1289 = shalt.err (!%p1286_p0)
}
 0x816   :  { %s1290_s27 = scalar_lea.hbm %s1623_s3, 256 }
 0x817   :  { %p1291_p1 = scmp.ne.s32.totalorder %s1623_s3, %s1290_s27  ;;  %p1294_p2 = scmp.lt.u32.totalorder %s1290_s27, %s1623_s3 }
 0x819   :  { %p1296_p3 = pnand %p1294_p2, %p1291_p1 }
 0x81b   :  { %1299 = shalt.err (!%p1296_p3)
}
 0x81c   :  { %1026 = dma.vmem_to_hbm [thread:$0]  %s1021_s23, 256, %s1623_s3, [#allocation5], %s1311_s0, %s1311_s0, %s1312_s15  }
 0x81d   :  { %1304 = dma.done.wait [#allocation5], 256  }
 0x81e   :  { %1305 = vsyncadd [#allocation5], 4294967040 }
 0x81f   :  { %1030 = vsyncpa [#allocation4], 1 }
 0x820   :  { %1031 = vsyncpa [#allocation7], 1 }
 0x821   :  { %1032 = vsyncpa [#allocation5], 1 }

</bundles_post_ra>
